<compile_context>
chip_gen: v6e
topology: v6e:2x2x1
jax: 0.10.0
libtpu: 0.0.40
codegen_flags: <defaults>
</compile_context>

<pallas_src>
import functools

import jax
import jax.numpy as jnp
from jax.experimental import pallas as pl
from jax.experimental.pallas import tpu as pltpu


def _rmsnorm_kernel(x_ref, w_ref, o_ref, *, eps, hidden):
    # x_ref: (row_tile, hidden_p) tile in VMEM
    # w_ref: (1, hidden_p) weight, constant block -> resident across the grid
    x = x_ref[...].astype(jnp.float32)
    # Sum of squares over the lane axis; divide by the TRUE hidden size so
    # zero-padding of the hidden dim does not change the mean.
    ss = jnp.sum(x * x, axis=-1, keepdims=True)
    ms = ss * (1.0 / float(hidden))
    inv = jax.lax.rsqrt(ms + jnp.float32(eps))
    w = w_ref[...].astype(jnp.float32)
    o_ref[...] = (w * (x * inv)).astype(o_ref.dtype)


def _round_up(a, b):
    return pl.cdiv(a, b) * b


def rmsnorm(x, weight, eps=1e-6, row_tile=None):
    """RMSNorm over the last axis of `x`, scaled by `weight` (shape [hidden])."""
    orig_shape = x.shape
    hidden = orig_shape[-1]
    rows = 1
    for d in orig_shape[:-1]:
        rows *= d

    itemsize = jnp.dtype(x.dtype).itemsize
    sub = max(8, 32 // itemsize)            # sublane multiple: 8 f32 / 16 bf16 / 32 i8
    hidden_p = _round_up(hidden, 128)       # lane-dense last dim

    # --- pick a row tile: ~4 MiB of x per grid step, multiple of `sub` ---
    if row_tile is None:
        target_tile_bytes = 4 << 20
        row_tile = target_tile_bytes // (hidden_p * itemsize)
        row_tile = max(sub, (row_tile // sub) * sub)
    else:
        row_tile = max(sub, _round_up(row_tile, sub))

    rows_sub = _round_up(rows, sub)
    row_tile = min(row_tile, rows_sub)
    # Prefer >= 2 grid steps when the input allows it (megacore on v7x).
    half = ((rows_sub // 2) // sub) * sub
    if half >= sub:
        row_tile = min(row_tile, half)

    grid_rows = pl.cdiv(rows, row_tile)
    rows_p = grid_rows * row_tile

    # --- wrapper-side zero padding (rows + hidden); sliced off at the end ---
    x2d = x.reshape(rows, hidden)
    pad_r = rows_p - rows
    pad_h = hidden_p - hidden
    if pad_r or pad_h:
        x2d = jnp.pad(x2d, ((0, pad_r), (0, pad_h)))
    w2d = weight.reshape(1, hidden)
    if pad_h:
        w2d = jnp.pad(w2d, ((0, 0), (0, pad_h)))
    w2d = w2d.astype(x.dtype)

    # --- VMEM budget: double-buffered in + out tiles + resident weight ---
    tile_bytes = row_tile * hidden_p * itemsize
    vmem_limit = 4 * tile_bytes + 2 * hidden_p * itemsize + (8 << 20)
    vmem_limit = int(max(16 << 20, min(vmem_limit, 64 << 20)))

    out = pl.pallas_call(
        functools.partial(_rmsnorm_kernel, eps=eps, hidden=hidden),
        out_shape=jax.ShapeDtypeStruct((rows_p, hidden_p), x.dtype),
        grid_spec=pltpu.PrefetchScalarGridSpec(
            num_scalar_prefetch=0,
            grid=(grid_rows,),
            in_specs=[
                pl.BlockSpec((row_tile, hidden_p), lambda i: (i, 0)),
                pl.BlockSpec((1, hidden_p), lambda i: (0, 0)),  # constant -> one DMA
            ],
            out_specs=pl.BlockSpec((row_tile, hidden_p), lambda i: (i, 0)),
        ),
        compiler_params=pltpu.CompilerParams(
            dimension_semantics=("parallel",),
            vmem_limit_bytes=vmem_limit,
        ),
    )(x2d, w2d)

    if pad_r or pad_h:
        out = out[:rows, :hidden]
    return out.reshape(orig_shape)


def rmsnorm_reference(x, weight, eps=1e-6):
    x32 = x.astype(jnp.float32)
    ms = jnp.mean(x32 * x32, axis=-1, keepdims=True)
    y = x32 * jax.lax.rsqrt(ms + eps)
    return (weight.astype(jnp.float32) * y).astype(x.dtype)


if __name__ == "__main__":
    key = jax.random.PRNGKey(0)
    batch, seq, hidden = 2, 8, 32

    x = jax.random.normal(key, (batch, seq, hidden), dtype=jnp.float32)
    # Deterministic parameter init: nn.Parameter(torch.ones(hidden_size)) -> ones
    weight = jnp.ones((hidden,), dtype=jnp.float32)

    out = rmsnorm(x, weight, eps=1e-6)
    out = jax.block_until_ready(out)

    ref = rmsnorm_reference(x, weight, eps=1e-6)
    assert out.shape == x.shape and out.dtype == x.dtype
    assert jnp.allclose(out, ref, atol=1e-5, rtol=1e-5)

    print("KERNEL_OK")
</pallas_src>

<mosaic_0001>
module attributes {stable_mosaic.version = 11 : i64} {
  func.func @_rmsnorm_kernel(%arg0: i32, %arg1: memref<8x128xf32, #tpu.memory_space<vmem>>, %arg2: memref<1x128xf32, #tpu.memory_space<vmem>>, %arg3: memref<8x128xf32, #tpu.memory_space<vmem>>) attributes {dimension_semantics = [#tpu.dimension_semantics<parallel>], iteration_bounds = array<i64: 2>, scalar_prefetch = 0 : i64, scratch_operands = 0 : i64, tpu.core_type = #tpu.core_type<tc>, window_params = [{transform_indices = @transform_0, window_bounds = array<i64: 8, 128>}, {pipeline_mode = #tpu.pipeline_mode<synchronous>, transform_indices = @transform_1, window_bounds = array<i64: 1, 128>}, {transform_indices = @transform_2, window_bounds = array<i64: 8, 128>}]} {
    %c0 = arith.constant 0 : index
    %c0_0 = arith.constant 0 : index
    %0 = vector.load %arg1[%c0, %c0_0] : memref<8x128xf32, #tpu.memory_space<vmem>>, vector<8x128xf32>
    %1 = arith.mulf %0, %0 : vector<8x128xf32>
    %cst = arith.constant dense<0.000000e+00> : vector<8xf32>
    %2 = vector.multi_reduction <add>, %1, %cst [1] : vector<8x128xf32> to vector<8xf32>
    %3 = vector.shape_cast %2 : vector<8xf32> to vector<8x1xf32>
    %cst_1 = arith.constant 3.125000e-02 : f32
    %4 = vector.broadcast %cst_1 : f32 to vector<8x1xf32>
    %5 = arith.mulf %3, %4 : vector<8x1xf32>
    %cst_2 = arith.constant 9.99999997E-7 : f32
    %6 = vector.broadcast %cst_2 : f32 to vector<8x1xf32>
    %7 = arith.addf %5, %6 : vector<8x1xf32>
    %8 = math.rsqrt %7 : vector<8x1xf32>
    %c0_3 = arith.constant 0 : index
    %c0_4 = arith.constant 0 : index
    %9 = vector.load %arg2[%c0_3, %c0_4] : memref<1x128xf32, #tpu.memory_space<vmem>>, vector<1x128xf32>
    %10 = vector.broadcast %8 : vector<8x1xf32> to vector<8x128xf32>
    %11 = arith.mulf %0, %10 : vector<8x128xf32>
    %12 = vector.broadcast %9 : vector<1x128xf32> to vector<8x128xf32>
    %13 = arith.mulf %12, %11 : vector<8x128xf32>
    %c0_5 = arith.constant 0 : index
    %c0_6 = arith.constant 0 : index
    %14 = vector.load %arg3[%c0_5, %c0_6] : memref<8x128xf32, #tpu.memory_space<vmem>>, vector<8x128xf32>
    tpu.vector_store %arg3[%c0_5, %c0_6], %13 {strides = array<i32>} : memref<8x128xf32, #tpu.memory_space<vmem>>, vector<8x128xf32>,
    return
  }
  func.func @transform_0(%arg0: i32) -> (i32, i32) {
    %c0_i32 = arith.constant 0 : i32
    %c0_i32_0 = arith.constant 0 : i32
    return %arg0, %c0_i32 : i32, i32
  }
  func.func @transform_1(%arg0: i32) -> (i32, i32) {
    %c0_i32 = arith.constant 0 : i32
    %c0_i32_0 = arith.constant 0 : i32
    %c0_i32_1 = arith.constant 0 : i32
    return %c0_i32, %c0_i32_0 : i32, i32
  }
  func.func @transform_2(%arg0: i32) -> (i32, i32) {
    %c0_i32 = arith.constant 0 : i32
    %c0_i32_0 = arith.constant 0 : i32
    return %arg0, %c0_i32 : i32, i32
  }
}

</mosaic_0001>

<bundles_post_ra>
// kernel: tpu_custom_call.1
= control target key start
LH: loop header
LB: loop body
LE: loop exit
PB: predicated region body
PF: predicated region fallthrough
CT: control target
= control target key end

     0   :  { %7 = vsyncpa [#allocation3], 0  ;;  %s576_s0 = inlined_call_operand.hbm [shape: f32[16,128], index: 0, kind: input, shape index: {}]   ;;  %s577_s1 = inlined_call_operand.vmem [shape: f32[1,128], index: 1, kind: input, shape index: {}]   ;;  %s578_s2 = inlined_call_operand.hbm [shape: f32[16,128], index: 2, kind: output, shape index: {}]  }
   0x1   :  { %9 = vsyncpa [#allocation3 + $0x1], 0 }
   0x2   :  { %10 = vsyncpa [#allocation4], 0 }
   0x3   :  { %12 = vsyncpa [#allocation4 + $0x1], 0  ;;  %s432_s9 = smov 0   ;;  %s434_s10 = smov 0  }
   0x4   :  { %s436_s11 = smov 0   ;;  %s438_s12 = smov 0  }
   0x5 LB: > { %s453_s13 = sadd.s32 4294967295, %s413_s12   ;;  %s260_s14 = sadd.s32 4294967294, %s413_s12   ;;  %s413_s12 = sphi %s438_s12, %s595_s12   ;;  %s409_s11 = sphi %s436_s11, %s594_s11   ;;  %s405_s10 = sphi %s434_s10, %s593_s10   ;;  %s401_s9 = sphi %s432_s9, %s592_s9  }
   0x6   : > { %s457_s15 = sadd.s32 1, %s413_s12   ;;  %s25_s16 = sadd.s32 1, %s409_s11 }
   0x7   : > { %s22_s17 = ssub.s32 %s413_s12, %s457_s15  ;;  %p32_p0 = scmp.ne.s32.totalorder %s409_s11, %s405_s10 }
   0x8   : > { %p23_p1 = scmp.eq.s32.totalorder %s22_s17, 0  ;;  %p33_p2 = scmp.eq.s32.totalorder %s413_s12, 0 }
   0x9   : > { %p38_p3 = scmp.ne.s32.totalorder %s405_s10, %s401_s9  ;;  %p39_p4 = scmp.eq.s32.totalorder %s453_s13, 0 }
   0xa   : > { %s469_s18 = scalar_select %p23_p1, %s409_s11, %s25_s16  }
   0xb   : > { %p471_p5 = por %p33_p2, %p32_p0  ;;  %p475_p6 = por %p39_p4, %p38_p3 }
   0xc   : > { %p83_p7 = scmp.eq.s32.totalorder %s453_s13, 1  ;;  %p89_p8 = scmp.eq.s32.totalorder %s260_s14, 1 }
   0xd   : > { %s582_s20 = scalar_select %p475_p6, 1, 0 }
   0xe   : > { %p285_p10 = scmp.lt.s32.totalorder %s413_s12, 2  ;;  %p482_p11 = por %p83_p7, %p32_p0 }
   0xf   : > { %p486_p12 = por %p89_p8, %p38_p3  ;;  %s112_s23 = sand.u32 1, %s409_s11  }
  0x10   : > { %s583_s21 = scalar_select %p482_p11, 1, 0 }
  0x11   : > { %s584_s22 = scalar_select %p486_p12, 1, 0 }
  0x12   : > { %s264_s24 = sshll.u32 %s413_s12, 7  ;;  %s263_s25 = sshll.u32 %s112_s23, 3 }
  0x13   : > { %s495_s28 = scalar_lea.hbm %s576_s0, %s264_s24  ;;  %s116_s29 = scalar_lea.vmem [#allocation2], %s263_s25 }
  0x14   : > { %s123_s30 = sshll.u32 %s116_s29, 4  ;;  %p499_p13 = pnand %p285_p10, %p471_p5  ;;  %s503_s30 = int_to_ptr.vmem [resolvable:$true] %s123_s30 }
  0x15   : > { %s113_s4 = scalar_lea.sflag [#allocation3], %s112_s23  ;;  %s321_s5 = scalar_lea.hbm %s495_s28, 128 }
  0x16   : > { %p322_p2 = scmp.ne.s32.totalorder %s495_s28, %s321_s5  ;;  %p323_p3 = pneg %p499_p13 }
  0x17   : > { %s326_s8 = scalar_lea.hbm %s576_s0, 256  ;;  %p327_p5 = scmp.lt.s32.totalorder %s495_s28, %s576_s0 }
  0x18   : > { %p324_p4 = pnand %p323_p3, %p322_p2  ;;  %p328_p8 = scmp.lt.s32.totalorder %s326_s8, %s321_s5 }
  0x1a   : > { %p325_p7 = pneg %p324_p4  ;;  %p329_p10 = por %p328_p8, %p327_p5 }
  0x1c   : > { %p330_p9 = pnand %p329_p10, %p325_p7 }
  0x1e   : > { %333 = shalt.err (!%p330_p9)
}
  0x1f   : > { %s334_s17 = scalar_lea.vmem %s503_s30, 128  ;;  %s415_s19 = smov [#allocation2]  }
  0x20   : > { %p335_p0 = scmp.ne.s32.totalorder %s503_s30, %s334_s17  ;;  %s339_s23 = sshll.u32 %s415_s19, 4  ;;  %s340_s23 = int_to_ptr.vmem [resolvable:$false] %s339_s23 }
  0x21   : > { %s341_s24 = scalar_lea.vmem %s340_s23, 256  ;;  %p342_p4 = scmp.lt.s32.totalorder %s503_s30, %s340_s23 }
  0x22   : > { %p337_p1 = pnand %p335_p0, %p323_p3  ;;  %p343_p12 = scmp.lt.s32.totalorder %s341_s24, %s334_s17 }
  0x24   : > { %p338_p2 = pneg %p337_p1  ;;  %p344_p11 = por %p343_p12, %p342_p4 }
  0x26   : > { %p345_p6 = pnand %p344_p11, %p338_p2 }
  0x28   : > { %348 = shalt.err (!%p345_p6)
}
  0x29   : > { %280 = dma.hbm_to_vmem [thread:$0]  (!%p499_p13), %s495_s28, 128, %s503_s30, %s113_s4  }
  0x2a   : > { %p586_p9 = scmp.lt.s32.totalorder %s413_s12, 3  ;;  %p587_p7 = scmp.ge.s32.totalorder %s413_s12, 1 }
  0x2c   : > { %p129_p0 = pnand %p587_p7, %p586_p9 }
  0x2d   : > { %s530_s25 = sand.u32 (!%p129_p0), 1, %s405_s10   ;;  %p588_p6 = scmp.ne.s32.totalorder (!%p129_p0), %s582_s20, 0 }
  0x2e   : > { %132 = sbr.rel (%p129_p0) target bundleno = 228 (0xe4), region = 28  ;;  %s266_s26 = sshll.u32 (!%p129_p0), %s530_s25, 3 }
  0x2f   : > { %s135_s27 = scalar_lea.sflag (!%p129_p0), [#allocation3], %s530_s25  ;;  %s138_s29 = scalar_lea.vmem (!%p129_p0), [#allocation2], %s266_s26 }
  0x33   : > { %392 = dma.done.wait (%p588_p6), %s135_s27, 128  }
  0x34   : > { %394 = vsyncadd (%p588_p6), %s135_s27, 4294967168  ;;  %v159_v0 = vld [vmem:[%s138_s29] sm:$0xff]  ;;  %s270_s3 = sshll.u32 %s453_s13, 7  ;;  %s158_s4 = scalar_lea.vmem [#allocation5], %s266_s26 }
  0x35   : > { %v160_v1 = vmul.f32 %v159_v0, %v159_v0  ;;  %v268_v6 = vld [vmem:[%s577_s1] ss:$0 sm:$0xff]  ;;  %s190_s5 = sshll.u32 %s158_s4, 4  ;;  %s188_s7 = scalar_lea.hbm %s578_s2, %s270_s3  ;;  %s191_s5 = int_to_ptr.vmem [resolvable:$true] %s190_s5 }
  0x36   : > { %s177_s8 = scalar_lea.sflag [#allocation4], %s530_s25  ;;  %s349_s14 = scalar_lea.vmem %s191_s5, 128 }
  0x37   : > { %161 = vadd.xlane.f32.xlu0 %v160_v1  ;;  %p350_p11 = scmp.ne.s32.totalorder %s191_s5, %s349_s14  ;;  %p589_p12 = scmp.ne.s32.totalorder %s583_s21, 0 }
  0x38   : > { %s416_s16 = smov [#allocation5]  }
  0x39   : > { %p351_p13 = pnand %p350_p11, %p589_p12  ;;  %s353_s17 = sshll.u32 %s416_s16, 4  ;;  %s354_s17 = int_to_ptr.vmem [resolvable:$false] %s353_s17 }
  0x3a   : > { %s355_s13 = scalar_lea.vmem %s354_s17, 256  ;;  %p356_p3 = scmp.lt.s32.totalorder %s191_s5, %s354_s17 }
  0x3b   : > { %p352_p1 = pneg %p351_p13  ;;  %p357_p5 = scmp.lt.s32.totalorder %s355_s13, %s349_s14 }
  0x3d   : > { %p358_p8 = por %p357_p5, %p356_p3 }
  0x3f   : > { %p359_p10 = pnand %p358_p8, %p352_p1 }
  0xc0   : > { %v162_v2 = vpop.xlane.xlu0 %161 }
  0xc1   : > { %v163_v3 = vmul.f32 0.03125, %v162_v2 }
  0xc3   : > { %v164_v4 = vadd.f32 1e-06, %v163_v3 }
  0xc5   : > { %319 = vrsqrt.f32 %v164_v4 }
  0xd2   : > { %v320_v5 = vpop.eup %319 }
  0xd3   : > { %v167_v7 = vmul.f32 %v320_v5, %v159_v0 }
  0xd5   : > { %v174_v8 = vmul.f32 %v268_v6, %v167_v7 }
  0xd7   : > { %175 = vst [vmem:[%s158_s4] sm:$0xff] %v174_v8 }
  0xd8   : > { %362 = shalt.err (!%p359_p10)
}
  0xd9   : > { %s363_s19 = scalar_lea.hbm %s188_s7, 128  ;;  %s367_s25 = scalar_lea.hbm %s578_s2, 256 }
  0xda   : > { %p364_p2 = scmp.ne.s32.totalorder %s188_s7, %s363_s19  ;;  %p368_p7 = scmp.lt.s32.totalorder %s188_s7, %s578_s2 }
  0xdb   : > { %p369_p0 = scmp.lt.s32.totalorder %s367_s25, %s363_s19 }
  0xdc   : > { %p365_p4 = pnand %p364_p2, %p589_p12 }
  0xdd   : > { %p370_p6 = por %p369_p0, %p368_p7 }
  0xde   : > { %p366_p9 = pneg %p365_p4 }
  0xe0   : > { %p371_p11 = pnand %p370_p6, %p366_p9 }
  0xe2   : > { %374 = shalt.err (!%p371_p11)
}
  0xe3   : > { %275 = dma.vmem_to_hbm [thread:$0]  (%p589_p12), %s191_s5, 128, %s188_s7, %s177_s8  }
  0xe4 PF: > { %s202_s29 = sand.u32 1, %s401_s9   ;;  %p590_p13 = scmp.ne.s32.totalorder %s584_s22, 0 }
  0xe5   : > { %p591_p1 = scmp.ge.s32.totalorder %s413_s12, 2  ;;  %s203_s28 = scalar_lea.sflag [#allocation4], %s202_s29 }
  0xe7   : > { %p282_p3 = pnand %p591_p1, %p590_p13 }
  0xe9   : > { %p283_p5 = pneg %p282_p3 }
  0xeb   : > { %396 = dma.done.wait (%p283_p5), %s203_s28, 128  }
  0xec   : > { %398 = vsyncadd (%p283_p5), %s203_s28, 4294967168  ;;  %p15_p8 = scmp.ge.s32.totalorder %s457_s15, 4   ;;  %s592_s9 = smov %s405_s10 }
  0xed   : > { %s593_s10 = smov %s409_s11  ;;  %s594_s11 = smov %s469_s18 }
  0xee   : > { %s595_s12 = smov %s457_s15  ;;  %17 = sbr.rel (!%p15_p8) target bundleno = 5 (0x5), region = 73 }
  0xf3   :  { %208 = vsyncpa [#allocation3], 1 }
  0xf4   :  { %210 = vsyncpa [#allocation3 + $0x1], 1 }
  0xf5   :  { %211 = vsyncpa [#allocation4], 1 }
  0xf6   :  { %213 = vsyncpa [#allocation4 + $0x1], 1 }

</bundles_post_ra>
